<compile_context>
chip_gen: v6e
topology: v6e:2x2x1
jax: 0.10.0
libtpu: 0.0.40
codegen_flags: <defaults>
</compile_context>

<pallas_src>
import functools

import jax
import jax.numpy as jnp
from jax.experimental import pallas as pl
from jax.experimental.pallas import tpu as pltpu


NEG_FILL = -100000000000.0  # matches output.data.fill_(-1e11) in GEM.forward


def _gem_forward_kernel(off_ref,      # SMEM (2,) int32: [offset1, offset2]
                        patches_ref,  # VMEM (B*HW, CKK)   bf16  im2col'd input, whole batch
                        pool_ref,     # VMEM (B, B*HW)     bf16  block-diagonal 1/HW pooling matrix
                        w1_ref,       # VMEM (CKK, hidden) bf16  conv weight as matmul
                        b1_ref,       # VMEM (1, hidden)   f32
                        w2_ref,       # VMEM (hidden, NCp) bf16  classifier weight (lane-padded)
                        b2_ref,       # VMEM (1, NCp)      f32
                        out_ref):     # VMEM (B, NCp)      f32
    # conv-as-matmul, bf16 operands -> f32 accumulation on the MXU
    feat = jnp.dot(patches_ref[...], w1_ref[...],
                   preferred_element_type=jnp.float32)
    feat = jnp.maximum(feat + b1_ref[...], 0.0)                  # (B*HW, hidden) f32

    # global average pool as an MXU matmul with a block-diagonal (1/HW) matrix
    gap = jnp.dot(pool_ref[...], feat.astype(jnp.bfloat16),
                  preferred_element_type=jnp.float32)            # (B, hidden) f32

    # classifier head for the whole batch (lane-padded N)
    logits = jnp.dot(gap.astype(jnp.bfloat16), w2_ref[...],
                     preferred_element_type=jnp.float32) + b2_ref[...]   # (B, NCp)

    # GEM task masking: keep columns in [offset1, offset2), fill the rest with -1e11.
    # Padded columns (>= n_classes) also get the fill value and are sliced off outside.
    o1 = off_ref[0]
    o2 = off_ref[1]
    col = jax.lax.broadcasted_iota(jnp.int32, logits.shape, 1)
    keep = (col >= o1) & (col < o2)
    out_ref[...] = jnp.where(keep, logits, jnp.float32(NEG_FILL))


def _im2col_nchw(x, k=3, pad=1):
    """NCHW -> (B, H*W, C*k*k) with (C, ky, kx) feature ordering (matches PyTorch conv weight)."""
    B, C, H, W = x.shape
    xp = jnp.pad(x, ((0, 0), (0, 0), (pad, pad), (pad, pad)))
    taps = []
    for dy in range(k):
        for dx in range(k):
            taps.append(xp[:, :, dy:dy + H, dx:dx + W])          # (B, C, H, W)
    p = jnp.stack(taps, axis=2)                                  # (B, C, k*k, H, W)
    p = p.transpose(0, 3, 4, 1, 2).reshape(B, H * W, C * k * k)  # (B, HW, C*k*k)
    return p


@functools.partial(jax.jit, static_argnames=("n_classes", "nc_per_task"))
def gem_forward(x, t, params, *, n_classes, nc_per_task):
    """x: (B, C, H, W) float32, t: scalar int task id."""
    w1, b1, w2, b2 = params
    B, C, H, W = x.shape
    HW = H * W
    CKK, hidden = w1.shape

    # im2col in the wrapper (9x the raw-input bytes; acceptable at this scale).
    patches = _im2col_nchw(x).reshape(B * HW, CKK).astype(jnp.bfloat16)   # (B*HW, CKK)

    # block-diagonal pooling matrix: pool[b, b*HW:(b+1)*HW] = 1/HW
    pool = (jnp.kron(jnp.eye(B, dtype=jnp.float32),
                     jnp.ones((1, HW), jnp.float32)) / HW).astype(jnp.bfloat16)  # (B, B*HW)

    # lane-dense classifier: pad the class axis to a multiple of 128
    nc_pad = ((n_classes + 127) // 128) * 128
    w2_p = jnp.zeros((hidden, nc_pad), jnp.float32).at[:, :n_classes].set(w2)
    b2_p = jnp.zeros((1, nc_pad), jnp.float32).at[0, :n_classes].set(b2)

    offset1 = (t * nc_per_task).astype(jnp.int32)
    offset2 = ((t + 1) * nc_per_task).astype(jnp.int32)
    offsets = jnp.stack([offset1, offset2])                      # (2,) int32 -> SMEM

    out_padded = pl.pallas_call(
        _gem_forward_kernel,
        out_shape=jax.ShapeDtypeStruct((B, nc_pad), jnp.float32),
        in_specs=[
            pl.BlockSpec(memory_space=pltpu.MemorySpace.SMEM),   # offsets
            pl.BlockSpec(memory_space=pltpu.MemorySpace.VMEM),   # patches
            pl.BlockSpec(memory_space=pltpu.MemorySpace.VMEM),   # pool
            pl.BlockSpec(memory_space=pltpu.MemorySpace.VMEM),   # w1
            pl.BlockSpec(memory_space=pltpu.MemorySpace.VMEM),   # b1
            pl.BlockSpec(memory_space=pltpu.MemorySpace.VMEM),   # w2 (padded)
            pl.BlockSpec(memory_space=pltpu.MemorySpace.VMEM),   # b2 (padded)
        ],
        out_specs=pl.BlockSpec(memory_space=pltpu.MemorySpace.VMEM),
        # Explicit VMEM budget (well above the toy working set, safe on v5e/v6e/v7x).
        compiler_params=pltpu.CompilerParams(
            vmem_limit_bytes=32 * 1024 * 1024),
    )(
        offsets,
        patches,
        pool,
        w1.astype(jnp.bfloat16),
        b1.reshape(1, hidden).astype(jnp.float32),
        w2_p.astype(jnp.bfloat16),
        b2_p,
    )

    return out_padded[:, :n_classes]


def init_params(key, in_channel, hidden, n_classes, k=3):
    k1, k2, k3, k4 = jax.random.split(key, 4)
    # conv weight in PyTorch layout (out, in, kh, kw) -> matmul layout (in*kh*kw, out)
    w_conv = jax.random.normal(k1, (hidden, in_channel, k, k), jnp.float32) * 0.1
    w1 = w_conv.reshape(hidden, in_channel * k * k).T            # (C*k*k, hidden)
    b1 = jax.random.normal(k2, (hidden,), jnp.float32) * 0.01
    w2 = jax.random.normal(k3, (hidden, n_classes), jnp.float32) * 0.1
    b2 = jax.random.normal(k4, (n_classes,), jnp.float32) * 0.01
    return (w1, b1, w2, b2)


if __name__ == "__main__":
    # small shapes consistent with the module: batch=2, in_channel=4, image_size=(16,16)
    B, C, H, W = 2, 4, 16, 16
    hidden = 32
    n_classes = 8
    n_tasks = 4
    nc_per_task = n_classes // n_tasks

    key = jax.random.PRNGKey(0)
    kx, kp = jax.random.split(key)
    x = jax.random.normal(kx, (B, C, H, W), jnp.float32)
    params = init_params(kp, C, hidden, n_classes)

    t = jnp.int32(1)  # task 1 -> keep columns [2, 4), fill the rest with -1e11
    out = gem_forward(x, t, params, n_classes=n_classes, nc_per_task=nc_per_task)
    out = jax.block_until_ready(out)

    assert out.shape == (B, n_classes)
    # columns outside the task window must be exactly the fill value
    assert bool(jnp.all(out[:, :2] == NEG_FILL))
    assert bool(jnp.all(out[:, 4:] == NEG_FILL))
    assert bool(jnp.all(out[:, 2:4] > NEG_FILL))

    print("KERNEL_OK")
</pallas_src>

<mosaic_0001>
module attributes {stable_mosaic.version = 11 : i64} {
  func.func @_gem_forward_kernel(%arg0: memref<2xi32, #tpu.memory_space<smem>>, %arg1: memref<512x36xbf16, #tpu.memory_space<vmem>>, %arg2: memref<2x512xbf16, #tpu.memory_space<vmem>>, %arg3: memref<36x32xbf16, #tpu.memory_space<vmem>>, %arg4: memref<1x32xf32, #tpu.memory_space<vmem>>, %arg5: memref<32x128xbf16, #tpu.memory_space<vmem>>, %arg6: memref<1x128xf32, #tpu.memory_space<vmem>>, %arg7: memref<2x128xf32, #tpu.memory_space<vmem>>) attributes {dimension_semantics = [], scalar_prefetch = 0 : i64, scratch_operands = 0 : i64, tpu.core_type = #tpu.core_type<tc>} {
    %c0 = arith.constant 0 : index
    %c0_0 = arith.constant 0 : index
    %0 = vector.load %arg1[%c0, %c0_0] : memref<512x36xbf16, #tpu.memory_space<vmem>>, vector<512x36xbf16>
    %c0_1 = arith.constant 0 : index
    %c0_2 = arith.constant 0 : index
    %1 = vector.load %arg3[%c0_1, %c0_2] : memref<36x32xbf16, #tpu.memory_space<vmem>>, vector<36x32xbf16>
    %cst = arith.constant dense<0.000000e+00> : vector<512x32xf32>
    %2 = tpu.matmul %0, %1, %cst {dimension_numbers = #tpu.dot_dimension_numbers<[1], [0], [0], [1], [0, 0, 1, 1], [], []>} : vector<512x36xbf16>, vector<36x32xbf16>, vector<512x32xf32> -> vector<512x32xf32>
    %c0_3 = arith.constant 0 : index
    %c0_4 = arith.constant 0 : index
    %3 = vector.load %arg4[%c0_3, %c0_4] : memref<1x32xf32, #tpu.memory_space<vmem>>, vector<1x32xf32>
    %4 = vector.broadcast %3 : vector<1x32xf32> to vector<512x32xf32>
    %5 = arith.addf %2, %4 : vector<512x32xf32>
    %cst_5 = arith.constant 0.000000e+00 : f32
    %6 = vector.broadcast %cst_5 : f32 to vector<512x32xf32>
    %7 = arith.maximumf %5, %6 : vector<512x32xf32>
    %c0_6 = arith.constant 0 : index
    %c0_7 = arith.constant 0 : index
    %8 = vector.load %arg2[%c0_6, %c0_7] : memref<2x512xbf16, #tpu.memory_space<vmem>>, vector<2x512xbf16>
    %9 = arith.truncf %7 : vector<512x32xf32> to vector<512x32xbf16>
    %cst_8 = arith.constant dense<0.000000e+00> : vector<2x32xf32>
    %10 = tpu.matmul %8, %9, %cst_8 {dimension_numbers = #tpu.dot_dimension_numbers<[1], [0], [0], [1], [0, 0, 1, 1], [], []>} : vector<2x512xbf16>, vector<512x32xbf16>, vector<2x32xf32> -> vector<2x32xf32>
    %11 = arith.truncf %10 : vector<2x32xf32> to vector<2x32xbf16>
    %c0_9 = arith.constant 0 : index
    %c0_10 = arith.constant 0 : index
    %12 = vector.load %arg5[%c0_9, %c0_10] : memref<32x128xbf16, #tpu.memory_space<vmem>>, vector<32x128xbf16>
    %cst_11 = arith.constant dense<0.000000e+00> : vector<2x128xf32>
    %13 = tpu.matmul %11, %12, %cst_11 {dimension_numbers = #tpu.dot_dimension_numbers<[1], [0], [0], [1], [0, 0, 1, 1], [], []>} : vector<2x32xbf16>, vector<32x128xbf16>, vector<2x128xf32> -> vector<2x128xf32>
    %c0_12 = arith.constant 0 : index
    %c0_13 = arith.constant 0 : index
    %14 = vector.load %arg6[%c0_12, %c0_13] : memref<1x128xf32, #tpu.memory_space<vmem>>, vector<1x128xf32>
    %15 = vector.broadcast %14 : vector<1x128xf32> to vector<2x128xf32>
    %16 = arith.addf %13, %15 : vector<2x128xf32>
    %c0_14 = arith.constant 0 : index
    %17 = memref.load %arg0[%c0_14] : memref<2xi32, #tpu.memory_space<smem>>
    %c1 = arith.constant 1 : index
    %18 = memref.load %arg0[%c1] : memref<2xi32, #tpu.memory_space<smem>>
    %19 = tpu.iota {dimensions = array<i32: 1>} : vector<2x128xi32>
    %20 = vector.broadcast %17 : i32 to vector<2x128xi32>
    %21 = arith.cmpi sge, %19, %20 : vector<2x128xi32>
    %22 = vector.broadcast %18 : i32 to vector<2x128xi32>
    %23 = arith.cmpi slt, %19, %22 : vector<2x128xi32>
    %24 = arith.andi %21, %23 : vector<2x128xi1>
    %cst_15 = arith.constant -9.99999979E+10 : f32
    %25 = vector.broadcast %cst_15 : f32 to vector<2x128xf32>
    %26 = arith.select %24, %16, %25 : vector<2x128xi1>, vector<2x128xf32>
    %c0_16 = arith.constant 0 : index
    %c0_17 = arith.constant 0 : index
    %27 = vector.load %arg7[%c0_16, %c0_17] : memref<2x128xf32, #tpu.memory_space<vmem>>, vector<2x128xf32>
    tpu.vector_store %arg7[%c0_16, %c0_17], %26 {strides = array<i32>} : memref<2x128xf32, #tpu.memory_space<vmem>>, vector<2x128xf32>,
    return
  }
}

</mosaic_0001>

<bundles_post_ra>
// kernel: gem_forward.1
= control target key start
LH: loop header
LB: loop body
LE: loop exit
PB: predicated region body
PF: predicated region fallthrough
CT: control target
= control target key end

     0   :  { %12 = vsyncpa [#allocation4], 0  ;;  %s1697_s0 = inlined_call_operand.vmem [shape: s32[2], index: 0, kind: input, shape index: {}]   ;;  %s1698_s1 = inlined_call_operand.vmem [shape: bf16[512,36], index: 1, kind: input, shape index: {}]   ;;  %s1699_s2 = inlined_call_operand.vmem [shape: bf16[2,512], index: 2, kind: input, shape index: {}]   ;;  %s1700_s3 = inlined_call_operand.vmem [shape: bf16[36,32], index: 3, kind: input, shape index: {}]   ;;  %s1701_s4 = inlined_call_operand.vmem [shape: f32[1,32], index: 4, kind: input, shape index: {}]   ;;  %s1702_s5 = inlined_call_operand.vmem [shape: bf16[32,128], index: 5, kind: input, shape index: {}]   ;;  %s1703_s6 = inlined_call_operand.vmem [shape: f32[1,128], index: 6, kind: input, shape index: {}]   ;;  %s1704_s7 = inlined_call_operand.hbm [shape: f32[2,128], index: 7, kind: output, shape index: {}]  }
   0x1   :  { %13 = vsyncpa [#allocation3], 0  ;;  %s20_s26 = sshll.u32 %s1697_s0, 4  ;;  %s21_s26 = int_to_ptr.vmem [resolvable:$true] %s20_s26 }
   0x2   :  { %s1266_s27 = scalar_lea.vmem %s21_s26, 16  ;;  %p1271_p1 = scmp.lt.s32.totalorder %s21_s26, %s21_s26 }
   0x3   :  { %p1267_p0 = scmp.ne.s32.totalorder %s21_s26, %s1266_s27  ;;  %p1272_p2 = scmp.lt.s32.totalorder %s1266_s27, %s1266_s27 }
   0x5   :  { %p1273_p3 = por %p1272_p2, %p1271_p1 }
   0x7   :  { %p1274_p4 = pnand %p1273_p3, %p1267_p0 }
   0x9   :  { %1277 = shalt.err (!%p1274_p4)
}
   0xa   :  { %s1302_s28 = smov [#allocation2]  }
   0xb   :  { %23 = dma.vmem_to_smem %s21_s26, 16, %s1302_s28, [#allocation4]  }
   0xc   :  { %1298 = dma.done.wait [#allocation4], 16  }
   0xd   :  { %1299 = vsyncadd [#allocation4], 4294967280 }
   0xe   :  { %39 = sfence }
   0xf   :  { %v1229_v0 = vld [vmem:[%s1700_s3 + $0x10] ss:$0 sps:$4 sm:$0x33]   ;;  %vm389_vm0 = vcmask 1041408   ;;  %v1230_v1 = vld [vmem:[%s1700_s3 + $0x8] sm:$0xff]   ;;  %vm292_vm1 = vcmask 293888   ;;  %v791_v38 = vlaneseq }
  0x10   :  { %1222 = vmatprep.subr.msk.bf16.mxu0 %vm389_vm0, %v1229_v0  ;;  %v391_v2 = vsel %vm389_vm0, %v1229_v0, 0  ;;  %1223 = vmatprep.subr.msk.bf16.mxu1 %vm389_vm0, %v1229_v0  ;;  %v1232_v3 = vld [vmem:[%s1698_s1] sm:$0xff]   ;;  %v1233_v5 = vld [vmem:[%s1698_s1 + $0x8] sm:$0xff]   ;;  %v1234_v6 = vld [vmem:[%s1698_s1 + $0x10] sm:$0xff]   ;;  %v1303_v36 = vmov 1966171168  }
  0x11   :  { %1139 = vmatpush3.bf16.msra.mxu0 %v391_v2  ;;  %1219 = vmatpush3.bf16.msra.mxu1 %v391_v2  ;;  %v1231_v4 = vld [vmem:[%s1700_s3] sm:$0xff]   ;;  %v1235_v7 = vld [vmem:[%s1698_s1 + $0x18] sm:$0xff]   ;;  %v1247_v8 = vld [vmem:[%s1698_s1 + $0xb0] sm:$0xff]   ;;  %v789_v37 = vunpack.c.l.s4 %v1303_v36  ;;  %v792_v40 = vshrl.u32 %v791_v38, 7  ;;  %vm1305_vm2 = vmmov 0   ;;  %vm912_vm3 = vcmask 261120  }
  0x12   :  { %1140 = vmatprep.subr.bf16.mxu0 %v1230_v1  ;;  %1217 = vmatprep.subr.bf16.mxu1 %v1230_v1  ;;  %v1236_v9 = vld [vmem:[%s1698_s1 + $0x20] sm:$0xff]   ;;  %v1249_v10 = vld [vmem:[%s1698_s1 + $0xb8] sm:$0xff]   ;;  %v1237_v12 = vld [vmem:[%s1698_s1 + $0x28] sm:$0xff]   ;;  %s956_s29 = sld [smem:[#allocation2]]  ;;  %s1306_s0 = smov [#allocation5]  }
  0x13   :  { %1144 = vmatprep.mubr.msk.bf16.mxu0 %vm292_vm1, %v1232_v3  ;;  %1188 = vmatprep.mubr.msk.bf16.mxu1 %vm292_vm1, %v1247_v8  ;;  %v1250_v11 = vld [vmem:[%s1698_s1 + $0xc0] sm:$0xff]   ;;  %v1238_v13 = vld [vmem:[%s1698_s1 + $0x30] sm:$0xff]   ;;  %v1251_v14 = vld [vmem:[%s1698_s1 + $0xc8] sm:$0xff]   ;;  %v790_v39 = vunpack.c.0.s8 %v789_v37  ;;  %s1055_s30 = sld [smem:[#allocation2 + $0x1]]  ;;  %s973_s9 = sshll.u32 %s1306_s0, 4  ;;  %s974_s9 = int_to_ptr.vmem [resolvable:$true] %s973_s9 }
  0x14   :  { %v1252_v15 = vld [vmem:[%s1698_s1 + $0xd0] sm:$0xff]   ;;  %v1239_v16 = vld [vmem:[%s1698_s1 + $0x38] sm:$0xff]   ;;  %v1240_v17 = vld [vmem:[%s1698_s1 + $0x40] sm:$0xff]   ;;  %s1278_s10 = scalar_lea.vmem %s974_s9, 32  ;;  %p1283_p6 = scmp.lt.s32.totalorder %s974_s9, %s974_s9 }
  0x15   :  { %1141 = vmatpush3.bf16.msra.mxu0 %v1230_v1  ;;  %1220 = vmatpush3.bf16.msra.mxu1 %v1230_v1  ;;  %v1253_v18 = vld [vmem:[%s1698_s1 + $0xd8] sm:$0xff]   ;;  %v1254_v19 = vld [vmem:[%s1698_s1 + $0xe0] sm:$0xff]   ;;  %v1241_v20 = vld [vmem:[%s1698_s1 + $0x48] sm:$0xff]   ;;  %v793_v43 = vsub.s32 %v790_v39, %v792_v40  ;;  %p1279_p5 = scmp.ne.s32.totalorder %s974_s9, %s1278_s10  ;;  %p1284_p7 = scmp.lt.s32.totalorder %s1278_s10, %s1278_s10 }
  0x16   :  { %1142 = vmatprep.subr.bf16.mxu0 %v1231_v4  ;;  %1218 = vmatprep.subr.bf16.mxu1 %v1231_v4  ;;  %v1256_v21 = vld [vmem:[%s1698_s1 + $0xe8] sm:$0xff]   ;;  %v1242_v22 = vld [vmem:[%s1698_s1 + $0x50] sm:$0xff]   ;;  %v1243_v24 = vld [vmem:[%s1698_s1 + $0x58] sm:$0xff]  }
  0x17   :  { %v1258_v23 = vld [vmem:[%s1698_s1 + $0xf0] sm:$0xff]   ;;  %v1260_v25 = vld [vmem:[%s1698_s1 + $0xf8] sm:$0xff]   ;;  %v1244_v26 = vld [vmem:[%s1698_s1 + $0x60] sm:$0xff]   ;;  %p1285_p8 = por %p1284_p7, %p1283_p6 }
  0x18   :  { %v1245_v27 = vld [vmem:[%s1698_s1 + $0x68] sm:$0xff]   ;;  %v1246_v28 = vld [vmem:[%s1698_s1 + $0x70] sm:$0xff]   ;;  %v1248_v29 = vld [vmem:[%s1698_s1 + $0x78] sm:$0xff]  }
  0x19   :  { %1143 = vmatpush3.bf16.msra.mxu0 %v1231_v4  ;;  %1221 = vmatpush3.bf16.msra.mxu1 %v1231_v4  ;;  %v1255_v30 = vld [vmem:[%s1698_s1 + $0x80] sm:$0xff]   ;;  %v1257_v31 = vld [vmem:[%s1698_s1 + $0x88] sm:$0xff]   ;;  %v1259_v32 = vld [vmem:[%s1698_s1 + $0x90] sm:$0xff]   ;;  %p1286_p9 = pnand %p1285_p8, %p1279_p5 }
  0x1a   :  { %v1261_v33 = vld [vmem:[%s1698_s1 + $0x98] sm:$0xff]   ;;  %v1262_v34 = vld [vmem:[%s1698_s1 + $0xa0] sm:$0xff]   ;;  %v1263_v35 = vld [vmem:[%s1698_s1 + $0xa8] sm:$0xff]  }
  0x1b   :  { %v1050_v41 = vld.sshfl [vmem:[%s1699_s2] sm:$0x33 pattern:$0x75316420] }
  0x1c   :  { %1145 = vmatmul.mubr.msk.bf16.vlgmr.msra.gmra.mxu0 %vm292_vm1, %v1233_v5  ;;  %1189 = vmatmul.mubr.msk.bf16.vlgmr.msra.gmra.mxu1 %vm292_vm1, %v1249_v10  ;;  %v787_v42 = vcombine.high %v1050_v41, %v1050_v41  ;;  %v1491_v44 = vrot.slane %v1050_v41, %v793_v43  ;;  %v1499_v47 = vld [vmem:[%s1701_s4] ss:$0 sm:$0xff] }
  0x1d   :  { %1148 = vmatprep.mubr.msk.bf16.mxu0 %vm292_vm1, %v1234_v6  ;;  %1192 = vmatprep.mubr.msk.bf16.mxu1 %vm292_vm1, %v1250_v11 }
  0x1e   :  { %v1493_v45 = vrot.slane %v787_v42, %v793_v43 }
  0x24   :  { %1149 = vmatmul.mubr.msk.bf16.gmra.mxu0 %vm292_vm1, %v1235_v7  ;;  %1193 = vmatmul.mubr.msk.bf16.gmra.mxu1 %vm292_vm1, %v1251_v14 }
  0x25   :  { %1152 = vmatprep.mubr.msk.bf16.mxu0 %vm292_vm1, %v1236_v9  ;;  %1196 = vmatprep.mubr.msk.bf16.mxu1 %vm292_vm1, %v1252_v15 }
  0x2c   :  { %1153 = vmatmul.mubr.msk.bf16.gmra.mxu0 %vm292_vm1, %v1237_v12  ;;  %1197 = vmatmul.mubr.msk.bf16.gmra.mxu1 %vm292_vm1, %v1253_v18 }
  0x2d   :  { %1156 = vmatprep.mubr.msk.bf16.mxu0 %vm292_vm1, %v1238_v13  ;;  %1200 = vmatprep.mubr.msk.bf16.mxu1 %vm292_vm1, %v1254_v19 }
  0x34   :  { %1157 = vmatmul.mubr.msk.bf16.gmra.mxu0 %vm292_vm1, %v1239_v16  ;;  %1201 = vmatmul.mubr.msk.bf16.gmra.mxu1 %vm292_vm1, %v1256_v21 }
  0x35   :  { %1160 = vmatprep.mubr.msk.bf16.mxu0 %vm292_vm1, %v1240_v17  ;;  %1204 = vmatprep.mubr.msk.bf16.mxu1 %vm292_vm1, %v1258_v23 }
  0x3c   :  { %1161 = vmatmul.mubr.msk.bf16.gmra.mxu0 %vm292_vm1, %v1241_v20  ;;  %1205 = vmatmul.mubr.msk.bf16.gmra.mxu1 %vm292_vm1, %v1260_v25 }
  0x3d   :  { %1164 = vmatprep.mubr.msk.bf16.mxu0 %vm292_vm1, %v1242_v22  ;;  %840 = vmatprep.mubr.bf16.mxu1 %v1493_v45 }
  0x44   :  { %1165 = vmatmul.mubr.msk.bf16.gmra.mxu0 %vm292_vm1, %v1243_v24 }
  0x45   :  { %1168 = vmatprep.mubr.msk.bf16.mxu0 %vm292_vm1, %v1244_v26 }
  0x4c   :  { %1169 = vmatmul.mubr.msk.bf16.gmra.mxu0 %vm292_vm1, %v1245_v27 }
  0x4d   :  { %1172 = vmatprep.mubr.msk.bf16.mxu0 %vm292_vm1, %v1246_v28 }
  0x54   :  { %1173 = vmatmul.mubr.msk.bf16.gmra.mxu0 %vm292_vm1, %v1248_v29 }
  0x55   :  { %1176 = vmatprep.mubr.msk.bf16.mxu0 %vm292_vm1, %v1255_v30 }
  0x5c   :  { %1177 = vmatmul.mubr.msk.bf16.gmra.mxu0 %vm292_vm1, %v1257_v31 }
  0x5d   :  { %1180 = vmatprep.mubr.msk.bf16.mxu0 %vm292_vm1, %v1259_v32 }
  0x64   :  { %1181 = vmatmul.mubr.msk.bf16.gmra.mxu0 %vm292_vm1, %v1261_v33 }
  0x65   :  { %1184 = vmatprep.mubr.msk.bf16.mxu0 %vm292_vm1, %v1262_v34 }
  0x6c   :  { %1185 = vmatmul.mubr.msk.bf16.gmra.mxu0 %vm292_vm1, %v1263_v35 }
  0xdc   :  { %v1146_v46 = vpop.f32.mrf.mxu0  ;;  %v1510_v1 = vpop.f32.mrf.mxu1 }
  0xdd   :  { %v436_v49 = vadd.f32 %v1146_v46, %v1499_v47 }
  0xde   :  { %v427_v48 = vpop.f32.mrf.mxu0  ;;  %v1517_v9 = vpop.f32.mrf.mxu1 }
  0xdf   :  { %v428_v51 = vadd.f32 %v1499_v47, %v427_v48  ;;  %v684_v54 = vmax.f32 %v436_v49, 0.0 }
  0xe0   :  { %v1147_v50 = vpop.f32.mrf.mxu0  ;;  %v1525_v16 = vpop.f32.mrf.mxu1 }
  0xe1   :  { %v439_v52 = vadd.f32 %v1147_v50, %v1499_v47  ;;  %v682_v58 = vmax.f32 %v428_v51, 0.0 }
  0xe2   :  { %v430_v53 = vpop.f32.mrf.mxu0  ;;  %v1529_v19 = vpop.f32.mrf.mxu1 }
  0xe3   :  { %v685_v55 = vmax.f32 %v439_v52, 0.0  ;;  %v431_v56 = vadd.f32 %v1499_v47, %v430_v53 }
  0xe4   :  { %v1150_v57 = vpop.f32.mrf.mxu0  ;;  %v1531_v22 = vpop.f32.mrf.mxu1 }
  0xe5   :  { %v1505_v59 = vpack.c.bf16 %v685_v55, %v684_v54  ;;  %v683_v60 = vmax.f32 %v431_v56, 0.0  ;;  %v452_v63 = vadd.f32 %v1150_v57, %v1499_v47 }
  0xe6   :  { %v443_v61 = vpop.f32.mrf.mxu0  ;;  %v1535_v25 = vpop.f32.mrf.mxu1 }
  0xe7   :  { %v1507_v62 = vpack.c.bf16 %v683_v60, %v682_v58  ;;  %v444_v2 = vadd.f32 %v1499_v47, %v443_v61  ;;  %v688_v5 = vmax.f32 %v452_v63, 0.0 }
  0xe8   :  { %v1151_v0 = vpop.f32.mrf.mxu0  ;;  %v1541_v28 = vpop.f32.mrf.mxu1 }
  0xe9   :  { %v455_v3 = vadd.f32 %v1151_v0, %v1499_v47  ;;  %v686_v10 = vmax.f32 %v444_v2, 0.0 }
  0xea   :  { %v446_v4 = vpop.f32.mrf.mxu0  ;;  %v1547_v31 = vpop.f32.mrf.mxu1 }
  0xeb   :  { %v689_v6 = vmax.f32 %v455_v3, 0.0  ;;  %v447_v7 = vadd.f32 %v1499_v47, %v446_v4 }
  0xec   :  { %v1515_v8 = vpop.f32.mrf.mxu0  ;;  %v1551_v34 = vpop.f32.mrf.mxu1 }
  0xed   :  { %v1519_v11 = vpack.c.bf16 %v689_v6, %v688_v5  ;;  %v687_v12 = vmax.f32 %v447_v7, 0.0 }
  0xee   :  { %v1521_v13 = vpop.f32.mrf.mxu0  ;;  %v1555_v37 = vpop.f32.mrf.mxu1 }
  0xef   :  { %v1523_v14 = vpack.c.bf16 %v687_v12, %v686_v10 }
  0xf0   :  { %v1155_v15 = vpop.f32.mrf.mxu0  ;;  %v1557_v41 = vpop.f32.mrf.mxu1 }
  0xf2   :  { %v1527_v17 = vpop.f32.mrf.mxu0  ;;  %v1559_v46 = vpop.f32.mrf.mxu1 }
  0xf4   :  { %v1158_v18 = vpop.f32.mrf.mxu0  ;;  %v1564_v53 = vpop.f32.mrf.mxu1 }
  0xf5   :  { %v484_v51 = vadd.f32 %v1158_v18, %v1499_v47  ;;  %v471_v18 = vadd.f32 %v1155_v15, %v1499_v47 }
  0xf6   :  { %v475_v20 = vpop.f32.mrf.mxu0  ;;  %v1574_v5 = vpop.f32.mrf.mxu1 }
  0xf7   :  { %v696_v2 = vmax.f32 %v484_v51, 0.0  ;;  %v476_v3 = vadd.f32 %v1499_v47, %v475_v20  ;;  %v468_v20 = vadd.f32 %v1515_v8, %v1499_v47 }
  0xf8   :  { %v1159_v21 = vpop.f32.mrf.mxu0 }
  0xf9   :  { %v487_v48 = vadd.f32 %v1159_v21, %v1499_v47 }
  0xfa   :  { %v478_v23 = vpop.f32.mrf.mxu0 }
  0xfb   :  { %v697_v56 = vmax.f32 %v487_v48, 0.0  ;;  %v479_v57 = vadd.f32 %v1499_v47, %v478_v23 }
  0xfc   :  { %v1533_v24 = vpop.f32.mrf.mxu0 }
  0xfd   :  { %v754_v21 = vpack.c.bf16 %v697_v56, %v696_v2  ;;  %v695_v23 = vmax.f32 %v479_v57, 0.0 }
  0xfe   :  { %v1537_v26 = vpop.f32.mrf.mxu0 }
 0x100   :  { %v1539_v27 = vpop.f32.mrf.mxu0 }
 0x102   :  { %v1543_v29 = vpop.f32.mrf.mxu0 }
 0x104   :  { %v1545_v30 = vpop.f32.mrf.mxu0 }
 0x106   :  { %v1549_v32 = vpop.f32.mrf.mxu0 }
 0x108   :  { %v1167_v33 = vpop.f32.mrf.mxu0 }
 0x109   :  { %v519_v57 = vadd.f32 %v1167_v33, %v1499_v47 }
 0x10a   :  { %v1553_v35 = vpop.f32.mrf.mxu0 }
 0x10b   :  { %v511_v33 = vadd.f32 %v1499_v47, %v1553_v35 }
 0x10c   :  { %v1170_v36 = vpop.f32.mrf.mxu0 }
 0x10d   :  { %v532_v6 = vadd.f32 %v1170_v36, %v1499_v47  ;;  %v1583_v36 = vpop.f32.mrf.mxu1 }
 0x10e   :  { %v523_v39 = vpop.f32.mrf.mxu0 }
 0x10f   :  { %v524_v15 = vadd.f32 %v1499_v47, %v523_v39 }
 0x110   :  { %v1171_v40 = vpop.f32.mrf.mxu0 }
 0x111   :  { %v535_v60 = vadd.f32 %v1171_v40, %v1499_v47 }
 0x112   :  { %v526_v42 = vpop.f32.mrf.mxu0 }
 0x113   :  { %v527_v48 = vadd.f32 %v1499_v47, %v526_v42 }
 0x114   :  { %v1174_v43 = vpop.f32.mrf.mxu0 }
 0x115   :  { %v548_v50 = vadd.f32 %v1174_v43, %v1499_v47  ;;  %v709_v43 = vmax.f32 %v535_v60, 0.0  ;;  %v692_v60 = vmax.f32 %v468_v20, 0.0  ;;  %v500_v20 = vadd.f32 %v1533_v24, %v1499_v47 }
 0x116   :  { %v539_v49 = vpop.f32.mrf.mxu0 }
 0x117   :  { %v540_v54 = vadd.f32 %v1499_v47, %v539_v49  ;;  %v712_v61 = vmax.f32 %v548_v50, 0.0  ;;  %v694_v50 = vmax.f32 %v476_v3, 0.0 }
 0x118   :  { %v1175_v52 = vpop.f32.mrf.mxu0 }
 0x119   :  { %v551_v55 = vadd.f32 %v1175_v52, %v1499_v47  ;;  %v710_v7 = vmax.f32 %v540_v54, 0.0  ;;  %v708_v52 = vmax.f32 %v532_v6, 0.0  ;;  %v693_v54 = vmax.f32 %v471_v18, 0.0 }
 0x11a   :  { %v542_v58 = vpop.f32.mrf.mxu0  ;;  %v753_v42 = vpack.c.bf16 %v695_v23, %v694_v50  ;;  %v705_v6 = vmax.f32 %v519_v57, 0.0  ;;  %v503_v23 = vadd.f32 %v1539_v27, %v1499_v47  ;;  %v492_v27 = vadd.f32 %v1499_v47, %v1537_v26 }
 0x11b   :  { %v713_v63 = vmax.f32 %v551_v55, 0.0  ;;  %v543_v0 = vadd.f32 %v1499_v47, %v542_v58  ;;  %v463_v55 = vadd.f32 %v1499_v47, %v1527_v17  ;;  %v760_v8 = vpack.c.bf16 %v709_v43, %v708_v52 }
 0x11c   :  { %v1572_v4 = vpop.f32.mrf.mxu0  ;;  %v707_v58 = vmax.f32 %v527_v48, 0.0  ;;  %v706_v17 = vmax.f32 %v524_v15, 0.0  ;;  %v752_v2 = vpack.c.bf16 %v693_v54, %v692_v60  ;;  %v703_v48 = vmax.f32 %v511_v33, 0.0 }
 0x11d   :  { %v762_v10 = vpack.c.bf16 %v713_v63, %v712_v61  ;;  %v711_v12 = vmax.f32 %v543_v0, 0.0  ;;  %v460_v61 = vadd.f32 %v1499_v47, %v1521_v13  ;;  %v1595_v63 = vpop.f32.mrf.mxu1  ;;  %v516_v0 = vadd.f32 %v1545_v30, %v1499_v47 }
 0x11e   :  { %v1578_v40 = vpop.f32.mrf.mxu0  ;;  %v691_v3 = vmax.f32 %v463_v55, 0.0  ;;  %v495_v52 = vadd.f32 %v1499_v47, %v1543_v29  ;;  %v698_v29 = vmax.f32 %v492_v27, 0.0  ;;  %v612_v26 = vadd.f32 %v1510_v1, %v1499_v47 }
 0x11f   :  { %v761_v49 = vpack.c.bf16 %v711_v12, %v710_v7  ;;  %1091 = vmatprep.subr.bf16.mxu1 %v762_v10  ;;  %v759_v7 = vpack.c.bf16 %v707_v58, %v706_v17  ;;  %v690_v13 = vmax.f32 %v460_v61, 0.0  ;;  %v1206_v12 = vpop.f32.mrf.mxu1  ;;  %v704_v18 = vmax.f32 %v516_v0, 0.0 }
 0x120   :  { %1092 = vmatpush3.bf16.msra.mxu1 %v754_v21  ;;  %v1585_v51 = vpop.f32.mrf.mxu0  ;;  %v508_v21 = vadd.f32 %v1499_v47, %v1549_v32  ;;  %v701_v32 = vmax.f32 %v503_v23, 0.0  ;;  %v699_v57 = vmax.f32 %v495_v52, 0.0  ;;  %v676_v24 = vadd.f32 %v1206_v12, %v1499_v47 }
 0x121   :  { %1093 = vmatprep.subr.bf16.mxu1 %v761_v49  ;;  %v751_v30 = vpack.c.bf16 %v691_v3, %v690_v13  ;;  %v758_v43 = vpack.c.bf16 %v705_v6, %v704_v18  ;;  %v667_v35 = vpop.f32.mrf.mxu1  ;;  %v728_v1 = vmax.f32 %v612_v26, 0.0  ;;  %v663_v12 = vadd.f32 %v1583_v36, %v1499_v47 }
 0x122   :  { %v1590_v56 = vpop.f32.mrf.mxu0  ;;  %v702_v50 = vmax.f32 %v508_v21, 0.0  ;;  %v755_v0 = vpack.c.bf16 %v699_v57, %v698_v29  ;;  %v744_v17 = vmax.f32 %v676_v24, 0.0  ;;  %v636_v24 = vadd.f32 %v1499_v47, %v1555_v37 }
 0x123   :  { %v1207_v55 = vpop.f32.mrf.mxu1  ;;  %v628_v37 = vadd.f32 %v1531_v22, %v1499_v47  ;;  %v620_v22 = vadd.f32 %v1499_v47, %v1535_v25  ;;  %v556_v25 = vadd.f32 %v1499_v47, %v1578_v40  ;;  %v802_v40 = vcombine.high %v1491_v44, %v1491_v44 }
 0x124   :  { %1094 = vmatpush3.bf16.msra.mxu1 %v753_v42  ;;  %v1597_v39 = vpop.f32.mrf.mxu0  ;;  %v757_v15 = vpack.c.bf16 %v703_v48, %v702_v50  ;;  %v700_v42 = vmax.f32 %v500_v20, 0.0  ;;  %v679_v58 = vadd.f32 %v1207_v55, %v1499_v47  ;;  %v652_v48 = vadd.f32 %v1499_v47, %v1574_v5 }
 0x125   :  { %1095 = vmatprep.subr.bf16.mxu1 %v760_v8  ;;  %v670_v61 = vpop.f32.mrf.mxu1  ;;  %v741_v20 = vmax.f32 %v663_v12, 0.0  ;;  %v655_v50 = vadd.f32 %v1499_v47, %v1595_v63  ;;  %v647_v63 = vadd.f32 %v1557_v41, %v1499_v47  ;;  %v639_v41 = vadd.f32 %v1499_v47, %v1559_v46 }
 0x126   :  { %v1603_v10 = vpop.f32.mrf.mxu0  ;;  %v756_v8 = vpack.c.bf16 %v701_v32, %v700_v42  ;;  %v745_v3 = vmax.f32 %v679_v58, 0.0  ;;  %v671_v6 = vadd.f32 %v1499_v47, %v670_v61  ;;  %v644_v32 = vadd.f32 %v1551_v34, %v1499_v47 }
 0x127   :  { %v738_v42 = vmax.f32 %v652_v48, 0.0  ;;  %v580_v34 = vadd.f32 %v1597_v39, %v1499_v47  ;;  %v737_v26 = vmax.f32 %v647_v63, 0.0  ;;  %v572_v39 = vadd.f32 %v1499_v47, %v1603_v10 }
 0x128   :  { %1096 = vmatpush3.bf16.msra.mxu1 %v752_v2  ;;  %v1609_v49 = vpop.f32.mrf.mxu0  ;;  %v668_v2 = vadd.f32 %v1499_v47, %v667_v35  ;;  %v778_v21 = vpack.c.bf16 %v745_v3, %v744_v17  ;;  %v567_v10 = vadd.f32 %v1585_v51, %v1499_v47  ;;  %v959_v63 = vand.u32 127, %v791_v38 }
 0x129   :  { %1097 = vmatprep.subr.bf16.mxu1 %v759_v7  ;;  %v607_v7 = vadd.f32 %v1499_v47, %v1529_v19  ;;  %v583_v58 = vadd.f32 %v1609_v49, %v1499_v47  ;;  %v720_v17 = vmax.f32 %v580_v34, 0.0 }
 0x12a   :  { %v1615_v54 = vpop.f32.mrf.mxu0  ;;  %v742_v18 = vmax.f32 %v668_v2, 0.0 }
 0x12b   :  { %v727_v19 = vmax.f32 %v607_v7, 0.0  ;;  %v721_v2 = vmax.f32 %v583_v58, 0.0  ;;  %v575_v49 = vadd.f32 %v1499_v47, %v1615_v54  ;;  %v564_v7 = vadd.f32 %v1572_v4, %v1499_v47 }
 0x12c   :  { %1098 = vmatpush3.bf16.msra.mxu1 %v751_v30  ;;  %v1186_v60 = vpop.f32.mrf.mxu0  ;;  %v743_v30 = vmax.f32 %v671_v6, 0.0  ;;  %v631_v6 = vadd.f32 %v1541_v28, %v1499_v47  ;;  %v623_v28 = vadd.f32 %v1499_v47, %v1547_v31  ;;  %v717_v4 = vmax.f32 %v567_v10, 0.0 }
 0x12d   :  { %1099 = vmatprep.subr.bf16.mxu1 %v758_v43  ;;  %v766_v54 = vpack.c.bf16 %v721_v2, %v720_v17 }
 0x12e   :  { %v587_v33 = vpop.f32.mrf.mxu0  ;;  %v733_v12 = vmax.f32 %v631_v6, 0.0 }
 0x130   :  { %1100 = vmatpush3.bf16.msra.mxu1 %v1519_v11  ;;  %v615_v11 = vadd.f32 %v1525_v16, %v1499_v47  ;;  %v660_v16 = vadd.f32 %v1564_v53, %v1499_v47  ;;  %v1187_v23 = vpop.f32.mrf.mxu0  ;;  %v596_v53 = vadd.f32 %v1186_v60, %v1499_v47 }
 0x131   :  { %1101 = vmatprep.subr.bf16.mxu1 %v757_v15  ;;  %v599_v36 = vadd.f32 %v1187_v23, %v1499_v47  ;;  %v588_v15 = vadd.f32 %v1499_v47, %v587_v33  ;;  %v734_v33 = vmax.f32 %v636_v24, 0.0  ;;  %v730_v23 = vmax.f32 %v620_v22, 0.0 }
 0x132   :  { %v729_v13 = vmax.f32 %v615_v11, 0.0  ;;  %v740_v35 = vmax.f32 %v660_v16, 0.0  ;;  %v724_v5 = vmax.f32 %v596_v53, 0.0  ;;  %v732_v16 = vmax.f32 %v628_v37, 0.0 }
 0x133   :  { %v725_v27 = vmax.f32 %v599_v36, 0.0  ;;  %v722_v60 = vmax.f32 %v588_v15, 0.0  ;;  %v1265_v36 = vld [vmem:[%s1702_s5] sm:$0xff]  }
 0x134   :  { %1102 = vmatpush3.bf16.msra.mxu1 %v1523_v14  ;;  %v604_v14 = vadd.f32 %v1499_v47, %v1517_v9  ;;  %v770_v43 = vpack.c.bf16 %v729_v13, %v728_v1  ;;  %v776_v57 = vpack.c.bf16 %v741_v20, %v740_v35  ;;  %v718_v1 = vmax.f32 %v572_v39, 0.0 }
 0x135   :  { %1103 = vmatprep.subr.bf16.mxu1 %v756_v8  ;;  %v739_v8 = vmax.f32 %v655_v50, 0.0  ;;  %v768_v29 = vpack.c.bf16 %v725_v27, %v724_v5  ;;  %v719_v13 = vmax.f32 %v575_v49, 0.0 }
 0x136   :  { %v726_v9 = vmax.f32 %v604_v14, 0.0  ;;  %v735_v14 = vmax.f32 %v639_v41, 0.0 }
 0x137   :  { %v775_v11 = vpack.c.bf16 %v739_v8, %v738_v42  ;;  %v765_v51 = vpack.c.bf16 %v719_v13, %v718_v1  ;;  %v960_v42 = vstv %s956_s29  ;;  %v1051_v8 = vld [vmem:[%s1703_s6] ss:$0 sm:$0xff] }
 0x138   :  { %1104 = vmatpush3.bf16.msra.mxu1 %v1505_v59  ;;  %v803_v59 = vcombine.high %v1493_v45, %v1493_v45  ;;  %v590_v45 = vpop.f32.mrf.mxu0  ;;  %v769_v52 = vpack.c.bf16 %v727_v19, %v726_v9  ;;  %v731_v9 = vmax.f32 %v623_v28, 0.0  ;;  %v714_v19 = vmax.f32 %v556_v25, 0.0 }
 0x139   :  { %1105 = vmatprep.subr.bf16.mxu1 %v755_v0  ;;  %v591_v55 = vadd.f32 %v1499_v47, %v590_v45  ;;  %v736_v0 = vmax.f32 %v644_v32, 0.0  ;;  %vm961_vm4 = vcmp.ge.s32.totalorder %v959_v63, %v960_v42 }
 0x13a   :  { %v771_v48 = vpack.c.bf16 %v731_v9, %v730_v23 }
 0x13b   :  { %v723_v61 = vmax.f32 %v591_v55, 0.0  ;;  %v774_v46 = vpack.c.bf16 %v737_v26, %v736_v0 }
 0x13c   :  { %1106 = vmatpush3.bf16.msra.mxu1 %v1507_v62  ;;  %v777_v62 = vpack.c.bf16 %v743_v30, %v742_v18  ;;  %v773_v18 = vpack.c.bf16 %v735_v14, %v734_v33  ;;  %v559_v30 = vadd.f32 %v1499_v47, %v1590_v56  ;;  %v1264_v47 = vld [vmem:[%s1702_s5 + $0x8] sm:$0xff]   ;;  %v1304_v56 = vmov 0.0  }
 0x13d   :  { %1113 = vmatprep.subr.bf16.mxu1 %v778_v21  ;;  %v767_v3 = vpack.c.bf16 %v723_v61, %v722_v60  ;;  %v716_v21 = vmax.f32 %v564_v7, 0.0 }
 0x13e   :  { %v715_v31 = vmax.f32 %v559_v30, 0.0 }
 0x13f   :  { %841 = vmatmul.mubr.bf16.vlgmr.msra.gmra.mxu1 %v1491_v44 }
 0x140   :  { %1114 = vmatpush3.bf16.msra.mxu1 %v770_v43  ;;  %880 = vmatprep.mubr.bf16.mxu1 %v803_v59  ;;  %v772_v59 = vpack.c.bf16 %v733_v12, %v732_v16  ;;  %v764_v43 = vpack.c.bf16 %v717_v4, %v716_v21  ;;  %v763_v53 = vpack.c.bf16 %v715_v31, %v714_v19 }
 0x141   :  { %1115 = vmatprep.subr.bf16.mxu1 %v777_v62 }
 0x144   :  { %1116 = vmatpush3.bf16.msra.mxu1 %v769_v52 }
 0x145   :  { %1117 = vmatprep.subr.bf16.mxu1 %v776_v57  ;;  %v962_v57 = vstv %s1055_s30 }
 0x146   :  { %vm963_vm5 = vcmp.lt.s32.totalorder %v959_v63, %v962_v57 }
 0x147   :  { %vm964_vm6 = vmand %vm961_vm4, %vm963_vm5 }
 0x148   :  { %1118 = vmatpush3.bf16.msra.mxu1 %v768_v29 }
 0x149   :  { %1119 = vmatprep.subr.bf16.mxu1 %v775_v11 }
 0x14c   :  { %1120 = vmatpush3.bf16.msra.mxu1 %v767_v3 }
 0x14d   :  { %1121 = vmatprep.subr.bf16.mxu1 %v774_v46 }
 0x150   :  { %1122 = vmatpush3.bf16.msra.mxu1 %v766_v54 }
 0x151   :  { %1123 = vmatprep.subr.bf16.mxu1 %v773_v18 }
 0x154   :  { %1124 = vmatpush3.bf16.msra.mxu1 %v765_v51 }
 0x155   :  { %1125 = vmatprep.subr.bf16.mxu1 %v772_v59 }
 0x158   :  { %1126 = vmatpush3.bf16.msra.mxu1 %v764_v43 }
 0x159   :  { %1127 = vmatprep.subr.bf16.mxu1 %v771_v48 }
 0x15c   :  { %1128 = vmatpush3.bf16.msra.mxu1 %v763_v53 }
 0x15d   :  { %1208 = vmatprep.subr.bf16.mxu1 %v1304_v56 }
 0x15f   :  { %881 = vmatmul.mubr.bf16.vlgmr.msra.gmra.mxu1 %v802_v40 }
 0x160   :  { %1209 = vmatpush3.bf16.msra.mxu1 %v1264_v47  ;;  %1212 = vmatprep.mubr.msk.bf16.mxu1 %vm1305_vm2, %v1304_v56 }
 0x161   :  { %1210 = vmatprep.subr.bf16.mxu1 %v1304_v56 }
 0x164   :  { %1211 = vmatpush3.bf16.msra.mxu1 %v1265_v36 }
 0x1ff   :  { %v1107_v35 = vpop.f32.mrf.mxu1 }
 0x201   :  { %v1108_v20 = vpop.f32.mrf.mxu1 }
 0x202   :  { %v1109_v52 = vadd.f32 %v1108_v20, %v1107_v35 }
 0x203   :  { %v1110_v44 = vpop.f32.mrf.mxu1 }
 0x205   :  { %v1111_v50 = vpop.f32.mrf.mxu1 }
 0x21f   :  { %v1129_v62 = vpop.f32.mrf.mxu1 }
 0x221   :  { %v1130_v45 = vpop.f32.mrf.mxu1 }
 0x222   :  { %v1131_v32 = vadd.f32 %v1130_v45, %v1129_v62 }
 0x223   :  { %v1132_v5 = vpop.f32.mrf.mxu1 }
 0x224   :  { %v883_v15 = vadd.f32 %v1131_v32, %v1109_v52 }
 0x225   :  { %v1133_v27 = vpop.f32.mrf.mxu1 }
 0x226   :  { %v888_v55 = vpack.c.bf16 %v883_v15, %v883_v15 }
 0x228   :  { %1213 = vmatmul.mubr.msk.bf16.vlgmr.msra.gmra.mxu1 %vm912_vm3, %v888_v55 }
 0x2e8   :  { %v950_v24 = vpop.f32.mrf.mxu1 }
 0x2e9   :  { %v951_v34 = vadd.f32 %v1051_v8, %v950_v24 }
 0x2ea   :  { %v1214_v58 = vpop.f32.mrf.mxu1 }
 0x2eb   :  { %v965_v60 = vsel %vm964_vm6, %v951_v34, -1e+11 }
 0x2ec   :  { %v953_v29 = vpop.f32.mrf.mxu1  ;;  %966 = vst [vmem:[#allocation5] sm:$0x3] %v965_v60 }
 0x2ed   :  { %1289 = shalt.err (!%p1286_p9)
}
 0x2ee   :  { %976 = dma.vmem_to_hbm [thread:$0]  %s974_s9, 32, %s1704_s7, [#allocation3]   ;;  %v1215_v38 = vpop.f32.mrf.mxu1 }
 0x2ef   :  { %1300 = dma.done.wait [#allocation3], 32  }
 0x2f0   :  { %1301 = vsyncadd [#allocation3], 4294967264 }
 0x2f1   :  { %980 = vsyncpa [#allocation3], 1 }
 0x2f2   :  { %981 = vsyncpa [#allocation4], 1 }

</bundles_post_ra>
